<compile_context>
chip_gen: v7x
topology: tpu7x:2x2x1
jax: 0.10.0
libtpu: 0.0.40
codegen_flags: <defaults>
</compile_context>

<pallas_src>
import functools

import jax
import jax.numpy as jnp
import numpy as np
from jax import lax
from jax.experimental import pallas as pl
from jax.experimental.pallas import tpu as pltpu

LANE = 128
SUBLANE = 8


def _round_up(x, m):
    return ((x + m - 1) // m) * m


def _fold_to_sublane(x):
    """(k*8, 128) -> (8, 128) by summing 8-row strips (pure vreg adds)."""
    rows = x.shape[0]
    acc = x[0:SUBLANE]
    for r in range(SUBLANE, rows, SUBLANE):
        acc = acc + x[r:r + SUBLANE]
    return acc


def _dice_kernel(score_ref, target_ref, oi_ref, op_ref, oy_ref, *,
                 num_class, tile_rows, chunk_rows, rows_total,
                 tiles_per_split, needs_mask):
    # score_ref : (1, C, tile_rows, 128)   score tile of sample n (all classes)
    # target_ref: (1, tile_rows, 128)      label tile of sample n
    # o*_ref    : (1, C-1, 8, 128) f32     per-(sample, split) partial sums
    s = pl.program_id(1)
    t = pl.program_id(2)

    @pl.when(t == 0)
    def _init():
        oi_ref[...] = jnp.zeros_like(oi_ref)
        op_ref[...] = jnp.zeros_like(op_ref)
        oy_ref[...] = jnp.zeros_like(oy_ref)

    num_chunks = tile_rows // chunk_rows
    # Global start row of this tile.  Phantom tiles of the 2-way split start
    # past rows_total; their DMA index is clamped in the index_map and their
    # contribution is masked to zero here.
    tile_row0 = (s * tiles_per_split + t) * tile_rows

    # TODO(synk): for very large num_class (>~16) switch the static class
    # unroll to an in-kernel lax.fori_loop over class chunks.
    def run(masked):
        zero = jnp.zeros((SUBLANE, LANE), jnp.float32)
        accs = [[zero, zero, zero] for _ in range(num_class - 1)]

        for j in range(num_chunks):                 # static, fully unrolled
            r0 = j * chunk_rows
            tgt = target_ref[0, r0:r0 + chunk_rows, :]        # (chunk, 128)
            if masked:
                row_ids = lax.broadcasted_iota(jnp.int32, (chunk_rows, LANE), 0)
                valid = row_ids < (rows_total - (tile_row0 + r0))
            for c in range(1, num_class):           # class innermost: tgt reused
                pre = score_ref[0, c, r0:r0 + chunk_rows, :].astype(jnp.float32)
                yb = tgt == c
                if masked:
                    yb = jnp.logical_and(yb, valid)
                    pre = jnp.where(valid, pre, 0.0)
                a = accs[c - 1]
                a[0] = a[0] + _fold_to_sublane(jnp.where(yb, pre, 0.0))
                a[1] = a[1] + _fold_to_sublane(pre)
                a[2] = a[2] + _fold_to_sublane(yb.astype(jnp.float32))

        for c in range(1, num_class):               # single output write per tile
            ai, ap, ay = accs[c - 1]
            oi_ref[0, c - 1] += ai
            op_ref[0, c - 1] += ap
            oy_ref[0, c - 1] += ay

    if needs_mask:
        is_edge = (tile_row0 + tile_rows) > rows_total

        @pl.when(is_edge)
        def _tail():
            run(True)

        @pl.when(jnp.logical_not(is_edge))
        def _full():
            run(False)
    else:
        run(False)


def _vmem_budget_bytes():
    try:
        phys = int(pltpu.get_tpu_info().vmem_capacity_bytes)
    except Exception:
        phys = 64 * 1024 * 1024            # conservative (v7x per-TC physical)
    return min(phys // 3, 20 * 1024 * 1024)


def dice_loss(score, target, num_class, epsilon=1e-5, max_tile_rows=2048):
    """Pallas implementation of DiceLoss.forward(score, target)."""
    N, C, D, H, W = score.shape
    assert C == num_class
    if num_class <= 1:
        return jnp.float32(0.0)

    L = D * H * W
    score3 = score.reshape(N, C, L)        # free views, no transpose
    target2 = target.reshape(N, L)

    # Tiny lane pad only when D*H*W is not a multiple of 128 (needed for the
    # free (N, C, R, 128) view).  Zero score / label-0 padding contributes
    # nothing to any class >= 1.
    # TODO(synk): the lane tail could also be masked in-kernel to avoid this
    # (rare) extra HBM copy.
    L128 = _round_up(L, LANE)
    if L128 != L:
        score3 = jnp.pad(score3, ((0, 0), (0, 0), (0, L128 - L)))
        target2 = jnp.pad(target2, ((0, 0), (0, L128 - L)))
    R = L128 // LANE
    score4 = score3.reshape(N, C, R, LANE)
    target3 = target2.reshape(N, R, LANE)

    # ---- tiling: big lane-dense tiles sized by a per-chip VMEM budget ------
    itemsize_s = jnp.dtype(score.dtype).itemsize
    itemsize_t = jnp.dtype(target.dtype).itemsize
    max_tile_rows = max(SUBLANE, (int(max_tile_rows) // SUBLANE) * SUBLANE)
    chunk_rows = min(64, _round_up(R, SUBLANE), max_tile_rows)
    chunk_rows = max(SUBLANE, (chunk_rows // SUBLANE) * SUBLANE)

    bytes_per_row = (C * itemsize_s + itemsize_t) * LANE * 2   # double-buffered
    budget = _vmem_budget_bytes()
    budget_rows = max(chunk_rows, budget // bytes_per_row)
    tile_rows = min(max_tile_rows, budget_rows, _round_up(R, chunk_rows))
    tile_rows = max(chunk_rows, (tile_rows // chunk_rows) * chunk_rows)

    T = pl.cdiv(R, tile_rows)            # real spatial tiles per sample
    NS = 2 if T >= 2 else 1              # 2-way spatial split (v7x dual-TC)
    TPS = pl.cdiv(T, NS)                 # tiles per split
    needs_mask = (NS * TPS * tile_rows) != R   # static: emit masked path?

    kernel = functools.partial(
        _dice_kernel, num_class=num_class, tile_rows=tile_rows,
        chunk_rows=chunk_rows, rows_total=R, tiles_per_split=TPS,
        needs_mask=needs_mask)

    def score_map(n, s, t):
        return (n, 0, jnp.minimum(s * TPS + t, T - 1), 0)

    def target_map(n, s, t):
        return (n, jnp.minimum(s * TPS + t, T - 1), 0)

    def out_map(n, s, t):
        return (n * NS + s, 0, 0, 0)

    part_shape = jax.ShapeDtypeStruct((N * NS, C - 1, SUBLANE, LANE),
                                      jnp.float32)
    out_spec = pl.BlockSpec((1, C - 1, SUBLANE, LANE), out_map)

    out_block_bytes = 3 * (C - 1) * SUBLANE * LANE * 4
    vmem_limit = int(min(max(bytes_per_row * tile_rows + 2 * out_block_bytes
                             + (4 << 20), 16 << 20), 32 << 20))

    bytes_accessed = (N * C * R * LANE * itemsize_s          # score, read once
                      + N * R * LANE * itemsize_t            # target, read once
                      + 3 * N * NS * (C - 1) * SUBLANE * LANE * 4)
    flops = 5 * N * R * LANE * (num_class - 1)

    oi, op, oy = pl.pallas_call(
        kernel,
        out_shape=(part_shape, part_shape, part_shape),
        grid_spec=pltpu.PrefetchScalarGridSpec(
            num_scalar_prefetch=0,
            grid=(N, NS, TPS),
            in_specs=[
                # all C classes of sample n, spatial tile (s, t) — score read once
                pl.BlockSpec((1, C, tile_rows, LANE), score_map),
                # target tile of sample n — read once, shared by all classes
                pl.BlockSpec((1, tile_rows, LANE), target_map),
            ],
            out_specs=(out_spec, out_spec, out_spec),
        ),
        compiler_params=pltpu.CompilerParams(
            dimension_semantics=("parallel", "parallel", "arbitrary"),
            vmem_limit_bytes=vmem_limit),
        cost_estimate=pl.CostEstimate(
            flops=flops, transcendentals=0, bytes_accessed=bytes_accessed),
    )(score4, target3)

    # Tiny final reduction + dice ratio in plain JAX glue.
    intersect = jnp.sum(oi, axis=(0, 2, 3))           # (C-1,)
    pre_sum = jnp.sum(op, axis=(0, 2, 3))
    y_sum = jnp.sum(oy, axis=(0, 2, 3))
    eps = jnp.float32(epsilon)
    dice = 2.0 * (intersect + eps) / (pre_sum + y_sum + eps)
    return jnp.float32(num_class - 1) - jnp.sum(dice)


def dice_loss_ref(score, target, num_class, epsilon=1e-5):
    """Pure-JAX reference mirroring the PyTorch forward exactly."""
    loss = 0.0
    for class_index in range(1, num_class):
        pre = score[:, class_index, :, :, :].astype(jnp.float32)
        y = (target == class_index).astype(jnp.float32)
        intersect = jnp.sum(pre * y)
        pre_sum = jnp.sum(pre)
        y_sum = jnp.sum(y)
        loss = loss + 2 * (intersect + epsilon) / (pre_sum + y_sum + epsilon)
    return num_class - 1 - loss


def _run_case(key, N, num_class, D, H, W, **kw):
    k_score, k_target = jax.random.split(key)
    logits = jax.random.normal(k_score, (N, num_class, D, H, W), jnp.float32)
    score = jax.nn.softmax(logits, axis=1)
    target = jax.random.randint(k_target, (N, D, H, W), 0, num_class,
                                dtype=jnp.int32)
    out = jax.block_until_ready(dice_loss(score, target, num_class, **kw))
    ref = jax.block_until_ready(dice_loss_ref(score, target, num_class))
    assert np.allclose(np.asarray(out), np.asarray(ref),
                       rtol=1e-4, atol=1e-4), (N, num_class, D, H, W, out, ref)


if __name__ == "__main__":
    key = jax.random.PRNGKey(0)
    k1, k2, k3 = jax.random.split(key, 3)
    # Canonical small case: aligned, single tile, unmasked fast path.
    _run_case(k1, N=2, num_class=4, D=16, H=16, W=16)
    # Multi-tile + 2-way spatial split + phantom/tail masking + chunk loop.
    _run_case(k2, N=1, num_class=3, D=32, H=32, W=20, max_tile_rows=128)
    # Non-128-aligned voxel count (lane pad) + tiny row count, masked tail.
    _run_case(k3, N=1, num_class=5, D=7, H=9, W=11)
    print("KERNEL_OK")
</pallas_src>

<mosaic_0001>
module attributes {stable_mosaic.version = 11 : i64} {
  func.func @_dice_kernel(%arg0: i32, %arg1: i32, %arg2: i32, %arg3: memref<1x4x32x128xf32, #tpu.memory_space<vmem>>, %arg4: memref<1x32x128xi32, #tpu.memory_space<vmem>>, %arg5: memref<1x3x8x128xf32, #tpu.memory_space<vmem>>, %arg6: memref<1x3x8x128xf32, #tpu.memory_space<vmem>>, %arg7: memref<1x3x8x128xf32, #tpu.memory_space<vmem>>) attributes {dimension_semantics = [#tpu.dimension_semantics<parallel>, #tpu.dimension_semantics<parallel>, #tpu.dimension_semantics<arbitrary>], iteration_bounds = array<i64: 2, 1, 1>, scalar_prefetch = 0 : i64, scratch_operands = 0 : i64, tpu.core_type = #tpu.core_type<tc>, window_params = [{transform_indices = @transform_0, window_bounds = array<i64: 1, 4, 32, 128>}, {transform_indices = @transform_1, window_bounds = array<i64: 1, 32, 128>}, {transform_indices = @transform_2, window_bounds = array<i64: 1, 3, 8, 128>}, {transform_indices = @transform_3, window_bounds = array<i64: 1, 3, 8, 128>}, {transform_indices = @transform_4, window_bounds = array<i64: 1, 3, 8, 128>}]} {
    %c0_i32 = arith.constant 0 : i32
    %0 = arith.cmpi eq, %arg2, %c0_i32 : i32
    %1 = arith.extui %0 : i1 to i32
    %c0_i32_0 = arith.constant 0 : i32
    %2 = arith.cmpi ne, %1, %c0_i32_0 : i32
    scf.if %2 {
      %cst_87 = arith.constant 0.000000e+00 : f32
      %156 = vector.broadcast %cst_87 : f32 to vector<1x3x8x128xf32>
      %c0_88 = arith.constant 0 : index
      %c0_89 = arith.constant 0 : index
      %c0_90 = arith.constant 0 : index
      %c0_91 = arith.constant 0 : index
      %157 = vector.load %arg5[%c0_88, %c0_89, %c0_90, %c0_91] : memref<1x3x8x128xf32, #tpu.memory_space<vmem>>, vector<1x3x8x128xf32>
      tpu.vector_store %arg5[%c0_88, %c0_89, %c0_90, %c0_91], %156 {strides = array<i32>} : memref<1x3x8x128xf32, #tpu.memory_space<vmem>>, vector<1x3x8x128xf32>,
      %cst_92 = arith.constant 0.000000e+00 : f32
      %158 = vector.broadcast %cst_92 : f32 to vector<1x3x8x128xf32>
      %c0_93 = arith.constant 0 : index
      %c0_94 = arith.constant 0 : index
      %c0_95 = arith.constant 0 : index
      %c0_96 = arith.constant 0 : index
      %159 = vector.load %arg6[%c0_93, %c0_94, %c0_95, %c0_96] : memref<1x3x8x128xf32, #tpu.memory_space<vmem>>, vector<1x3x8x128xf32>
      tpu.vector_store %arg6[%c0_93, %c0_94, %c0_95, %c0_96], %158 {strides = array<i32>} : memref<1x3x8x128xf32, #tpu.memory_space<vmem>>, vector<1x3x8x128xf32>,
      %cst_97 = arith.constant 0.000000e+00 : f32
      %160 = vector.broadcast %cst_97 : f32 to vector<1x3x8x128xf32>
      %c0_98 = arith.constant 0 : index
      %c0_99 = arith.constant 0 : index
      %c0_100 = arith.constant 0 : index
      %c0_101 = arith.constant 0 : index
      %161 = vector.load %arg7[%c0_98, %c0_99, %c0_100, %c0_101] : memref<1x3x8x128xf32, #tpu.memory_space<vmem>>, vector<1x3x8x128xf32>
      tpu.vector_store %arg7[%c0_98, %c0_99, %c0_100, %c0_101], %160 {strides = array<i32>} : memref<1x3x8x128xf32, #tpu.memory_space<vmem>>, vector<1x3x8x128xf32>,
    } else {
    }
    %cst = arith.constant 0.000000e+00 : f32
    %3 = vector.broadcast %cst : f32 to vector<8x128xf32>
    %c0 = arith.constant 0 : index
    %c0_1 = arith.constant 0 : index
    %c0_2 = arith.constant 0 : index
    %4 = vector.load %arg4[%c0, %c0_1, %c0_2] : memref<1x32x128xi32, #tpu.memory_space<vmem>>, vector<1x32x128xi32>
    %5 = vector.shape_cast %4 : vector<1x32x128xi32> to vector<32x128xi32>
    %c0_3 = arith.constant 0 : index
    %c1 = arith.constant 1 : index
    %c0_4 = arith.constant 0 : index
    %c0_5 = arith.constant 0 : index
    %6 = vector.load %arg3[%c0_3, %c1, %c0_4, %c0_5] : memref<1x4x32x128xf32, #tpu.memory_space<vmem>>, vector<1x1x32x128xf32>
    %7 = vector.shape_cast %6 : vector<1x1x32x128xf32> to vector<32x128xf32>
    %c1_i32 = arith.constant 1 : i32
    %8 = vector.broadcast %c1_i32 : i32 to vector<32x128xi32>
    %9 = arith.cmpi eq, %5, %8 : vector<32x128xi32>
    %cst_6 = arith.constant 0.000000e+00 : f32
    %10 = vector.broadcast %cst_6 : f32 to vector<32x128xf32>
    %11 = arith.select %9, %7, %10 : vector<32x128xi1>, vector<32x128xf32>
    %12 = vector.extract_strided_slice %11 {offsets = [0, 0], sizes = [8, 128], strides = [1, 1]} : vector<32x128xf32> to vector<8x128xf32>
    %13 = vector.extract_strided_slice %11 {offsets = [8, 0], sizes = [8, 128], strides = [1, 1]} : vector<32x128xf32> to vector<8x128xf32>
    %14 = arith.addf %12, %13 : vector<8x128xf32>
    %15 = vector.extract_strided_slice %11 {offsets = [16, 0], sizes = [8, 128], strides = [1, 1]} : vector<32x128xf32> to vector<8x128xf32>
    %16 = arith.addf %14, %15 : vector<8x128xf32>
    %17 = vector.extract_strided_slice %11 {offsets = [24, 0], sizes = [8, 128], strides = [1, 1]} : vector<32x128xf32> to vector<8x128xf32>
    %18 = arith.addf %16, %17 : vector<8x128xf32>
    %19 = arith.addf %3, %18 : vector<8x128xf32>
    %20 = vector.extract_strided_slice %7 {offsets = [0, 0], sizes = [8, 128], strides = [1, 1]} : vector<32x128xf32> to vector<8x128xf32>
    %21 = vector.extract_strided_slice %7 {offsets = [8, 0], sizes = [8, 128], strides = [1, 1]} : vector<32x128xf32> to vector<8x128xf32>
    %22 = arith.addf %20, %21 : vector<8x128xf32>
    %23 = vector.extract_strided_slice %7 {offsets = [16, 0], sizes = [8, 128], strides = [1, 1]} : vector<32x128xf32> to vector<8x128xf32>
    %24 = arith.addf %22, %23 : vector<8x128xf32>
    %25 = vector.extract_strided_slice %7 {offsets = [24, 0], sizes = [8, 128], strides = [1, 1]} : vector<32x128xf32> to vector<8x128xf32>
    %26 = arith.addf %24, %25 : vector<8x128xf32>
    %27 = arith.addf %3, %26 : vector<8x128xf32>
    %28 = arith.extui %9 : vector<32x128xi1> to vector<32x128xi32>
    %29 = arith.sitofp %28 : vector<32x128xi32> to vector<32x128xf32>
    %30 = vector.extract_strided_slice %29 {offsets = [0, 0], sizes = [8, 128], strides = [1, 1]} : vector<32x128xf32> to vector<8x128xf32>
    %31 = vector.extract_strided_slice %29 {offsets = [8, 0], sizes = [8, 128], strides = [1, 1]} : vector<32x128xf32> to vector<8x128xf32>
    %32 = arith.addf %30, %31 : vector<8x128xf32>
    %33 = vector.extract_strided_slice %29 {offsets = [16, 0], sizes = [8, 128], strides = [1, 1]} : vector<32x128xf32> to vector<8x128xf32>
    %34 = arith.addf %32, %33 : vector<8x128xf32>
    %35 = vector.extract_strided_slice %29 {offsets = [24, 0], sizes = [8, 128], strides = [1, 1]} : vector<32x128xf32> to vector<8x128xf32>
    %36 = arith.addf %34, %35 : vector<8x128xf32>
    %37 = arith.addf %3, %36 : vector<8x128xf32>
    %c0_7 = arith.constant 0 : index
    %c2 = arith.constant 2 : index
    %c0_8 = arith.constant 0 : index
    %c0_9 = arith.constant 0 : index
    %38 = vector.load %arg3[%c0_7, %c2, %c0_8, %c0_9] : memref<1x4x32x128xf32, #tpu.memory_space<vmem>>, vector<1x1x32x128xf32>
    %39 = vector.shape_cast %38 : vector<1x1x32x128xf32> to vector<32x128xf32>
    %c2_i32 = arith.constant 2 : i32
    %40 = vector.broadcast %c2_i32 : i32 to vector<32x128xi32>
    %41 = arith.cmpi eq, %5, %40 : vector<32x128xi32>
    %cst_10 = arith.constant 0.000000e+00 : f32
    %42 = vector.broadcast %cst_10 : f32 to vector<32x128xf32>
    %43 = arith.select %41, %39, %42 : vector<32x128xi1>, vector<32x128xf32>
    %44 = vector.extract_strided_slice %43 {offsets = [0, 0], sizes = [8, 128], strides = [1, 1]} : vector<32x128xf32> to vector<8x128xf32>
    %45 = vector.extract_strided_slice %43 {offsets = [8, 0], sizes = [8, 128], strides = [1, 1]} : vector<32x128xf32> to vector<8x128xf32>
    %46 = arith.addf %44, %45 : vector<8x128xf32>
    %47 = vector.extract_strided_slice %43 {offsets = [16, 0], sizes = [8, 128], strides = [1, 1]} : vector<32x128xf32> to vector<8x128xf32>
    %48 = arith.addf %46, %47 : vector<8x128xf32>
    %49 = vector.extract_strided_slice %43 {offsets = [24, 0], sizes = [8, 128], strides = [1, 1]} : vector<32x128xf32> to vector<8x128xf32>
    %50 = arith.addf %48, %49 : vector<8x128xf32>
    %51 = arith.addf %3, %50 : vector<8x128xf32>
    %52 = vector.extract_strided_slice %39 {offsets = [0, 0], sizes = [8, 128], strides = [1, 1]} : vector<32x128xf32> to vector<8x128xf32>
    %53 = vector.extract_strided_slice %39 {offsets = [8, 0], sizes = [8, 128], strides = [1, 1]} : vector<32x128xf32> to vector<8x128xf32>
    %54 = arith.addf %52, %53 : vector<8x128xf32>
    %55 = vector.extract_strided_slice %39 {offsets = [16, 0], sizes = [8, 128], strides = [1, 1]} : vector<32x128xf32> to vector<8x128xf32>
    %56 = arith.addf %54, %55 : vector<8x128xf32>
    %57 = vector.extract_strided_slice %39 {offsets = [24, 0], sizes = [8, 128], strides = [1, 1]} : vector<32x128xf32> to vector<8x128xf32>
    %58 = arith.addf %56, %57 : vector<8x128xf32>
    %59 = arith.addf %3, %58 : vector<8x128xf32>
    %60 = arith.extui %41 : vector<32x128xi1> to vector<32x128xi32>
    %61 = arith.sitofp %60 : vector<32x128xi32> to vector<32x128xf32>
    %62 = vector.extract_strided_slice %61 {offsets = [0, 0], sizes = [8, 128], strides = [1, 1]} : vector<32x128xf32> to vector<8x128xf32>
    %63 = vector.extract_strided_slice %61 {offsets = [8, 0], sizes = [8, 128], strides = [1, 1]} : vector<32x128xf32> to vector<8x128xf32>
    %64 = arith.addf %62, %63 : vector<8x128xf32>
    %65 = vector.extract_strided_slice %61 {offsets = [16, 0], sizes = [8, 128], strides = [1, 1]} : vector<32x128xf32> to vector<8x128xf32>
    %66 = arith.addf %64, %65 : vector<8x128xf32>
    %67 = vector.extract_strided_slice %61 {offsets = [24, 0], sizes = [8, 128], strides = [1, 1]} : vector<32x128xf32> to vector<8x128xf32>
    %68 = arith.addf %66, %67 : vector<8x128xf32>
    %69 = arith.addf %3, %68 : vector<8x128xf32>
    %c0_11 = arith.constant 0 : index
    %c3 = arith.constant 3 : index
    %c0_12 = arith.constant 0 : index
    %c0_13 = arith.constant 0 : index
    %70 = vector.load %arg3[%c0_11, %c3, %c0_12, %c0_13] : memref<1x4x32x128xf32, #tpu.memory_space<vmem>>, vector<1x1x32x128xf32>
    %71 = vector.shape_cast %70 : vector<1x1x32x128xf32> to vector<32x128xf32>
    %c3_i32 = arith.constant 3 : i32
    %72 = vector.broadcast %c3_i32 : i32 to vector<32x128xi32>
    %73 = arith.cmpi eq, %5, %72 : vector<32x128xi32>
    %cst_14 = arith.constant 0.000000e+00 : f32
    %74 = vector.broadcast %cst_14 : f32 to vector<32x128xf32>
    %75 = arith.select %73, %71, %74 : vector<32x128xi1>, vector<32x128xf32>
    %76 = vector.extract_strided_slice %75 {offsets = [0, 0], sizes = [8, 128], strides = [1, 1]} : vector<32x128xf32> to vector<8x128xf32>
    %77 = vector.extract_strided_slice %75 {offsets = [8, 0], sizes = [8, 128], strides = [1, 1]} : vector<32x128xf32> to vector<8x128xf32>
    %78 = arith.addf %76, %77 : vector<8x128xf32>
    %79 = vector.extract_strided_slice %75 {offsets = [16, 0], sizes = [8, 128], strides = [1, 1]} : vector<32x128xf32> to vector<8x128xf32>
    %80 = arith.addf %78, %79 : vector<8x128xf32>
    %81 = vector.extract_strided_slice %75 {offsets = [24, 0], sizes = [8, 128], strides = [1, 1]} : vector<32x128xf32> to vector<8x128xf32>
    %82 = arith.addf %80, %81 : vector<8x128xf32>
    %83 = arith.addf %3, %82 : vector<8x128xf32>
    %84 = vector.extract_strided_slice %71 {offsets = [0, 0], sizes = [8, 128], strides = [1, 1]} : vector<32x128xf32> to vector<8x128xf32>
    %85 = vector.extract_strided_slice %71 {offsets = [8, 0], sizes = [8, 128], strides = [1, 1]} : vector<32x128xf32> to vector<8x128xf32>
    %86 = arith.addf %84, %85 : vector<8x128xf32>
    %87 = vector.extract_strided_slice %71 {offsets = [16, 0], sizes = [8, 128], strides = [1, 1]} : vector<32x128xf32> to vector<8x128xf32>
    %88 = arith.addf %86, %87 : vector<8x128xf32>
    %89 = vector.extract_strided_slice %71 {offsets = [24, 0], sizes = [8, 128], strides = [1, 1]} : vector<32x128xf32> to vector<8x128xf32>
    %90 = arith.addf %88, %89 : vector<8x128xf32>
    %91 = arith.addf %3, %90 : vector<8x128xf32>
    %92 = arith.extui %73 : vector<32x128xi1> to vector<32x128xi32>
    %93 = arith.sitofp %92 : vector<32x128xi32> to vector<32x128xf32>
    %94 = vector.extract_strided_slice %93 {offsets = [0, 0], sizes = [8, 128], strides = [1, 1]} : vector<32x128xf32> to vector<8x128xf32>
    %95 = vector.extract_strided_slice %93 {offsets = [8, 0], sizes = [8, 128], strides = [1, 1]} : vector<32x128xf32> to vector<8x128xf32>
    %96 = arith.addf %94, %95 : vector<8x128xf32>
    %97 = vector.extract_strided_slice %93 {offsets = [16, 0], sizes = [8, 128], strides = [1, 1]} : vector<32x128xf32> to vector<8x128xf32>
    %98 = arith.addf %96, %97 : vector<8x128xf32>
    %99 = vector.extract_strided_slice %93 {offsets = [24, 0], sizes = [8, 128], strides = [1, 1]} : vector<32x128xf32> to vector<8x128xf32>
    %100 = arith.addf %98, %99 : vector<8x128xf32>
    %101 = arith.addf %3, %100 : vector<8x128xf32>
    %c0_15 = arith.constant 0 : index
    %c0_16 = arith.constant 0 : index
    %c0_17 = arith.constant 0 : index
    %c0_18 = arith.constant 0 : index
    %102 = vector.load %arg5[%c0_15, %c0_16, %c0_17, %c0_18] : memref<1x3x8x128xf32, #tpu.memory_space<vmem>>, vector<1x1x8x128xf32>
    %103 = vector.shape_cast %102 : vector<1x1x8x128xf32> to vector<8x128xf32>
    %104 = arith.addf %103, %19 : vector<8x128xf32>
    %c0_19 = arith.constant 0 : index
    %c0_20 = arith.constant 0 : index
    %c0_21 = arith.constant 0 : index
    %c0_22 = arith.constant 0 : index
    %105 = vector.load %arg5[%c0_19, %c0_20, %c0_21, %c0_22] : memref<1x3x8x128xf32, #tpu.memory_space<vmem>>, vector<1x1x8x128xf32>
    %106 = vector.shape_cast %105 : vector<1x1x8x128xf32> to vector<8x128xf32>
    %107 = vector.shape_cast %104 : vector<8x128xf32> to vector<1x1x8x128xf32>
    tpu.vector_store %arg5[%c0_19, %c0_20, %c0_21, %c0_22], %107 {strides = array<i32>} : memref<1x3x8x128xf32, #tpu.memory_space<vmem>>, vector<1x1x8x128xf32>,
    %c0_23 = arith.constant 0 : index
    %c0_24 = arith.constant 0 : index
    %c0_25 = arith.constant 0 : index
    %c0_26 = arith.constant 0 : index
    %108 = vector.load %arg6[%c0_23, %c0_24, %c0_25, %c0_26] : memref<1x3x8x128xf32, #tpu.memory_space<vmem>>, vector<1x1x8x128xf32>
    %109 = vector.shape_cast %108 : vector<1x1x8x128xf32> to vector<8x128xf32>
    %110 = arith.addf %109, %27 : vector<8x128xf32>
    %c0_27 = arith.constant 0 : index
    %c0_28 = arith.constant 0 : index
    %c0_29 = arith.constant 0 : index
    %c0_30 = arith.constant 0 : index
    %111 = vector.load %arg6[%c0_27, %c0_28, %c0_29, %c0_30] : memref<1x3x8x128xf32, #tpu.memory_space<vmem>>, vector<1x1x8x128xf32>
    %112 = vector.shape_cast %111 : vector<1x1x8x128xf32> to vector<8x128xf32>
    %113 = vector.shape_cast %110 : vector<8x128xf32> to vector<1x1x8x128xf32>
    tpu.vector_store %arg6[%c0_27, %c0_28, %c0_29, %c0_30], %113 {strides = array<i32>} : memref<1x3x8x128xf32, #tpu.memory_space<vmem>>, vector<1x1x8x128xf32>,
    %c0_31 = arith.constant 0 : index
    %c0_32 = arith.constant 0 : index
    %c0_33 = arith.constant 0 : index
    %c0_34 = arith.constant 0 : index
    %114 = vector.load %arg7[%c0_31, %c0_32, %c0_33, %c0_34] : memref<1x3x8x128xf32, #tpu.memory_space<vmem>>, vector<1x1x8x128xf32>
    %115 = vector.shape_cast %114 : vector<1x1x8x128xf32> to vector<8x128xf32>
    %116 = arith.addf %115, %37 : vector<8x128xf32>
    %c0_35 = arith.constant 0 : index
    %c0_36 = arith.constant 0 : index
    %c0_37 = arith.constant 0 : index
    %c0_38 = arith.constant 0 : index
    %117 = vector.load %arg7[%c0_35, %c0_36, %c0_37, %c0_38] : memref<1x3x8x128xf32, #tpu.memory_space<vmem>>, vector<1x1x8x128xf32>
    %118 = vector.shape_cast %117 : vector<1x1x8x128xf32> to vector<8x128xf32>
    %119 = vector.shape_cast %116 : vector<8x128xf32> to vector<1x1x8x128xf32>
    tpu.vector_store %arg7[%c0_35, %c0_36, %c0_37, %c0_38], %119 {strides = array<i32>} : memref<1x3x8x128xf32, #tpu.memory_space<vmem>>, vector<1x1x8x128xf32>,
    %c0_39 = arith.constant 0 : index
    %c1_40 = arith.constant 1 : index
    %c0_41 = arith.constant 0 : index
    %c0_42 = arith.constant 0 : index
    %120 = vector.load %arg5[%c0_39, %c1_40, %c0_41, %c0_42] : memref<1x3x8x128xf32, #tpu.memory_space<vmem>>, vector<1x1x8x128xf32>
    %121 = vector.shape_cast %120 : vector<1x1x8x128xf32> to vector<8x128xf32>
    %122 = arith.addf %121, %51 : vector<8x128xf32>
    %c0_43 = arith.constant 0 : index
    %c1_44 = arith.constant 1 : index
    %c0_45 = arith.constant 0 : index
    %c0_46 = arith.constant 0 : index
    %123 = vector.load %arg5[%c0_43, %c1_44, %c0_45, %c0_46] : memref<1x3x8x128xf32, #tpu.memory_space<vmem>>, vector<1x1x8x128xf32>
    %124 = vector.shape_cast %123 : vector<1x1x8x128xf32> to vector<8x128xf32>
    %125 = vector.shape_cast %122 : vector<8x128xf32> to vector<1x1x8x128xf32>
    tpu.vector_store %arg5[%c0_43, %c1_44, %c0_45, %c0_46], %125 {strides = array<i32>} : memref<1x3x8x128xf32, #tpu.memory_space<vmem>>, vector<1x1x8x128xf32>,
    %c0_47 = arith.constant 0 : index
    %c1_48 = arith.constant 1 : index
    %c0_49 = arith.constant 0 : index
    %c0_50 = arith.constant 0 : index
    %126 = vector.load %arg6[%c0_47, %c1_48, %c0_49, %c0_50] : memref<1x3x8x128xf32, #tpu.memory_space<vmem>>, vector<1x1x8x128xf32>
    %127 = vector.shape_cast %126 : vector<1x1x8x128xf32> to vector<8x128xf32>
    %128 = arith.addf %127, %59 : vector<8x128xf32>
    %c0_51 = arith.constant 0 : index
    %c1_52 = arith.constant 1 : index
    %c0_53 = arith.constant 0 : index
    %c0_54 = arith.constant 0 : index
    %129 = vector.load %arg6[%c0_51, %c1_52, %c0_53, %c0_54] : memref<1x3x8x128xf32, #tpu.memory_space<vmem>>, vector<1x1x8x128xf32>
    %130 = vector.shape_cast %129 : vector<1x1x8x128xf32> to vector<8x128xf32>
    %131 = vector.shape_cast %128 : vector<8x128xf32> to vector<1x1x8x128xf32>
    tpu.vector_store %arg6[%c0_51, %c1_52, %c0_53, %c0_54], %131 {strides = array<i32>} : memref<1x3x8x128xf32, #tpu.memory_space<vmem>>, vector<1x1x8x128xf32>,
    %c0_55 = arith.constant 0 : index
    %c1_56 = arith.constant 1 : index
    %c0_57 = arith.constant 0 : index
    %c0_58 = arith.constant 0 : index
    %132 = vector.load %arg7[%c0_55, %c1_56, %c0_57, %c0_58] : memref<1x3x8x128xf32, #tpu.memory_space<vmem>>, vector<1x1x8x128xf32>
    %133 = vector.shape_cast %132 : vector<1x1x8x128xf32> to vector<8x128xf32>
    %134 = arith.addf %133, %69 : vector<8x128xf32>
    %c0_59 = arith.constant 0 : index
    %c1_60 = arith.constant 1 : index
    %c0_61 = arith.constant 0 : index
    %c0_62 = arith.constant 0 : index
    %135 = vector.load %arg7[%c0_59, %c1_60, %c0_61, %c0_62] : memref<1x3x8x128xf32, #tpu.memory_space<vmem>>, vector<1x1x8x128xf32>
    %136 = vector.shape_cast %135 : vector<1x1x8x128xf32> to vector<8x128xf32>
    %137 = vector.shape_cast %134 : vector<8x128xf32> to vector<1x1x8x128xf32>
    tpu.vector_store %arg7[%c0_59, %c1_60, %c0_61, %c0_62], %137 {strides = array<i32>} : memref<1x3x8x128xf32, #tpu.memory_space<vmem>>, vector<1x1x8x128xf32>,
    %c0_63 = arith.constant 0 : index
    %c2_64 = arith.constant 2 : index
    %c0_65 = arith.constant 0 : index
    %c0_66 = arith.constant 0 : index
    %138 = vector.load %arg5[%c0_63, %c2_64, %c0_65, %c0_66] : memref<1x3x8x128xf32, #tpu.memory_space<vmem>>, vector<1x1x8x128xf32>
    %139 = vector.shape_cast %138 : vector<1x1x8x128xf32> to vector<8x128xf32>
    %140 = arith.addf %139, %83 : vector<8x128xf32>
    %c0_67 = arith.constant 0 : index
    %c2_68 = arith.constant 2 : index
    %c0_69 = arith.constant 0 : index
    %c0_70 = arith.constant 0 : index
    %141 = vector.load %arg5[%c0_67, %c2_68, %c0_69, %c0_70] : memref<1x3x8x128xf32, #tpu.memory_space<vmem>>, vector<1x1x8x128xf32>
    %142 = vector.shape_cast %141 : vector<1x1x8x128xf32> to vector<8x128xf32>
    %143 = vector.shape_cast %140 : vector<8x128xf32> to vector<1x1x8x128xf32>
    tpu.vector_store %arg5[%c0_67, %c2_68, %c0_69, %c0_70], %143 {strides = array<i32>} : memref<1x3x8x128xf32, #tpu.memory_space<vmem>>, vector<1x1x8x128xf32>,
    %c0_71 = arith.constant 0 : index
    %c2_72 = arith.constant 2 : index
    %c0_73 = arith.constant 0 : index
    %c0_74 = arith.constant 0 : index
    %144 = vector.load %arg6[%c0_71, %c2_72, %c0_73, %c0_74] : memref<1x3x8x128xf32, #tpu.memory_space<vmem>>, vector<1x1x8x128xf32>
    %145 = vector.shape_cast %144 : vector<1x1x8x128xf32> to vector<8x128xf32>
    %146 = arith.addf %145, %91 : vector<8x128xf32>
    %c0_75 = arith.constant 0 : index
    %c2_76 = arith.constant 2 : index
    %c0_77 = arith.constant 0 : index
    %c0_78 = arith.constant 0 : index
    %147 = vector.load %arg6[%c0_75, %c2_76, %c0_77, %c0_78] : memref<1x3x8x128xf32, #tpu.memory_space<vmem>>, vector<1x1x8x128xf32>
    %148 = vector.shape_cast %147 : vector<1x1x8x128xf32> to vector<8x128xf32>
    %149 = vector.shape_cast %146 : vector<8x128xf32> to vector<1x1x8x128xf32>
    tpu.vector_store %arg6[%c0_75, %c2_76, %c0_77, %c0_78], %149 {strides = array<i32>} : memref<1x3x8x128xf32, #tpu.memory_space<vmem>>, vector<1x1x8x128xf32>,
    %c0_79 = arith.constant 0 : index
    %c2_80 = arith.constant 2 : index
    %c0_81 = arith.constant 0 : index
    %c0_82 = arith.constant 0 : index
    %150 = vector.load %arg7[%c0_79, %c2_80, %c0_81, %c0_82] : memref<1x3x8x128xf32, #tpu.memory_space<vmem>>, vector<1x1x8x128xf32>
    %151 = vector.shape_cast %150 : vector<1x1x8x128xf32> to vector<8x128xf32>
    %152 = arith.addf %151, %101 : vector<8x128xf32>
    %c0_83 = arith.constant 0 : index
    %c2_84 = arith.constant 2 : index
    %c0_85 = arith.constant 0 : index
    %c0_86 = arith.constant 0 : index
    %153 = vector.load %arg7[%c0_83, %c2_84, %c0_85, %c0_86] : memref<1x3x8x128xf32, #tpu.memory_space<vmem>>, vector<1x1x8x128xf32>
    %154 = vector.shape_cast %153 : vector<1x1x8x128xf32> to vector<8x128xf32>
    %155 = vector.shape_cast %152 : vector<8x128xf32> to vector<1x1x8x128xf32>
    tpu.vector_store %arg7[%c0_83, %c2_84, %c0_85, %c0_86], %155 {strides = array<i32>} : memref<1x3x8x128xf32, #tpu.memory_space<vmem>>, vector<1x1x8x128xf32>,
    return
  }
  func.func @transform_0(%arg0: i32, %arg1: i32, %arg2: i32) -> (i32, i32, i32, i32) {
    %c1_i32 = arith.constant 1 : i32
    %0 = arith.muli %arg1, %c1_i32 : i32
    %1 = arith.addi %0, %arg2 : i32
    %c0_i32 = arith.constant 0 : i32
    %2 = arith.minsi %1, %c0_i32 : i32
    %c0_i32_0 = arith.constant 0 : i32
    %c0_i32_1 = arith.constant 0 : i32
    %c0_i32_2 = arith.constant 0 : i32
    return %arg0, %c0_i32_0, %2, %c0_i32_1 : i32, i32, i32, i32
  }
  func.func @transform_1(%arg0: i32, %arg1: i32, %arg2: i32) -> (i32, i32, i32) {
    %c1_i32 = arith.constant 1 : i32
    %0 = arith.muli %arg1, %c1_i32 : i32
    %1 = arith.addi %0, %arg2 : i32
    %c0_i32 = arith.constant 0 : i32
    %2 = arith.minsi %1, %c0_i32 : i32
    %c0_i32_0 = arith.constant 0 : i32
    %c0_i32_1 = arith.constant 0 : i32
    return %arg0, %2, %c0_i32_0 : i32, i32, i32
  }
  func.func @transform_2(%arg0: i32, %arg1: i32, %arg2: i32) -> (i32, i32, i32, i32) {
    %c1_i32 = arith.constant 1 : i32
    %0 = arith.muli %arg0, %c1_i32 : i32
    %1 = arith.addi %0, %arg1 : i32
    %c0_i32 = arith.constant 0 : i32
    %c0_i32_0 = arith.constant 0 : i32
    %c0_i32_1 = arith.constant 0 : i32
    %c0_i32_2 = arith.constant 0 : i32
    return %1, %c0_i32, %c0_i32_0, %c0_i32_1 : i32, i32, i32, i32
  }
  func.func @transform_3(%arg0: i32, %arg1: i32, %arg2: i32) -> (i32, i32, i32, i32) {
    %c1_i32 = arith.constant 1 : i32
    %0 = arith.muli %arg0, %c1_i32 : i32
    %1 = arith.addi %0, %arg1 : i32
    %c0_i32 = arith.constant 0 : i32
    %c0_i32_0 = arith.constant 0 : i32
    %c0_i32_1 = arith.constant 0 : i32
    %c0_i32_2 = arith.constant 0 : i32
    return %1, %c0_i32, %c0_i32_0, %c0_i32_1 : i32, i32, i32, i32
  }
  func.func @transform_4(%arg0: i32, %arg1: i32, %arg2: i32) -> (i32, i32, i32, i32) {
    %c1_i32 = arith.constant 1 : i32
    %0 = arith.muli %arg0, %c1_i32 : i32
    %1 = arith.addi %0, %arg1 : i32
    %c0_i32 = arith.constant 0 : i32
    %c0_i32_0 = arith.constant 0 : i32
    %c0_i32_1 = arith.constant 0 : i32
    %c0_i32_2 = arith.constant 0 : i32
    return %1, %c0_i32, %c0_i32_0, %c0_i32_1 : i32, i32, i32, i32
  }
}

</mosaic_0001>

<bundles_post_ra>
// kernel: tpu_custom_call.1
= control target key start
LH: loop header
LB: loop body
LE: loop exit
PB: predicated region body
PF: predicated region fallthrough
CT: control target
= control target key end

     0   :  { %s1506_s0 = inlined_call_operand.hbm [shape: f32[2,4,32,128], index: 0, kind: input, shape index: {}]   ;;  %s1507_s1 = inlined_call_operand.hbm [shape: s32[2,32,128], index: 1, kind: input, shape index: {}]   ;;  %s1508_s2 = inlined_call_operand.hbm [shape: f32[2,3,8,128], index: 2, kind: output, shape index: {0}]   ;;  %s1509_s3 = inlined_call_operand.hbm [shape: f32[2,3,8,128], index: 3, kind: output, shape index: {1}]   ;;  %s1510_s4 = inlined_call_operand.hbm [shape: f32[2,3,8,128], index: 4, kind: output, shape index: {2}]  }
   0x1   :  { %1515 = sst [smem:[#allocation15_spill]] %s1506_s0 }
   0x2   :  { %10 = vsyncpa [#allocation3], 0 }
   0x3   :  { %12 = vsyncpa [#allocation3 + $0x1], 0 }
   0x4   :  { %13 = vsyncpa [#allocation6], 0 }
   0x5   :  { %15 = vsyncpa [#allocation6 + $0x1], 0 }
   0x6   :  { %16 = vsyncpa [#allocation4], 0 }
   0x7   :  { %18 = vsyncpa [#allocation4 + $0x1], 0 }
   0x8   :  { %19 = vsyncpa [#allocation9], 0 }
   0x9   :  { %21 = vsyncpa [#allocation9 + $0x1], 0  ;;  %s1106_s15 = smov 0   ;;  %s1108_s16 = smov 0  }
   0xa   :  { %s1110_s17 = smov 0   ;;  %s1112_s18 = smov 0  }
   0xb   :  { %s1114_s19 = smov 0   ;;  %s1116_s20 = smov 0  }
   0xc LB: > { %s1137_s21 = sadd.s32 4294967295, %s1069_s20   ;;  %s1512_s22 = sadd.s32 4294967294, %s1069_s20   ;;  %s1069_s20 = sphi %s1116_s20, %s27_s20   ;;  %s1065_s19 = sphi %s1114_s19, %s1534_s19   ;;  %s1061_s18 = sphi %s1112_s18, %s1533_s18   ;;  %s1057_s17 = sphi %s1110_s17, %s1532_s17   ;;  %s1053_s16 = sphi %s1108_s16, %s1531_s16   ;;  %s1049_s15 = sphi %s1106_s15, %s1530_s15  }
   0xd   : > { %s46_s23 = sadd.s32 1, %s1065_s19  ;;  %s61_s24 = sadd.s32 1, %s1057_s17 }
   0xe   : > { %p48_p0 = scmp.ge.s32.totalorder %s46_s23, 2  ;;  %p68_p1 = scmp.ne.s32.totalorder %s1057_s17, %s1053_s16 }
   0xf   : > { %p69_p2 = scmp.eq.s32.totalorder %s1069_s20, 0  ;;  %p74_p3 = scmp.ne.s32.totalorder %s1053_s16, %s1049_s15 }
  0x10   : > { %s1536_s23 = smov (%p48_p0, %s46_s23), 0  ;;  %p75_p5 = scmp.eq.s32.totalorder %s1137_s21, 0 }
  0x11   : > { %p1149_p4 = por %p69_p2, %p68_p1  ;;  %s56_s26 = ssub.s32 %s1065_s19, %s1536_s23 }
  0x12   : > { %p134_p6 = scmp.eq.s32.totalorder %s1137_s21, 1  ;;  %p59_p7 = scmp.eq.s32.totalorder %s56_s26, 0 }
  0x13   : > { %p1157_p8 = por %p75_p5, %p74_p3  ;;  %p140_p10 = scmp.eq.s32.totalorder %s1512_s22, 1 }
  0x14   : > { %p1161_p9 = por %p134_p6, %p68_p1  ;;  %p808_p13 = scmp.lt.s32.totalorder %s1069_s20, 2 }
  0x15   : > { %s1517_s27 = scalar_select %p1157_p8, 1, 0 }
  0x16   : > { %s1518_s28 = scalar_select %p1161_p9, 1, 0 }
  0x17   : > { %s1168_s29 = scalar_select %p59_p7, %s1057_s17, %s61_s24  }
  0x18   : > { %p1170_p11 = por %p140_p10, %p74_p3  ;;  %s1177_s5 = sand.u32 1, %s1057_s17  }
  0x19   : > { %s725_s6 = sshll.u32 %s1177_s5, 7  ;;  %s775_s7 = sshll.u32 %s1065_s19, 11 }
  0x1a   : > { %s1519_s30 = scalar_select %p1170_p11, 1, 0 }
  0x1b   : > { %s1520_s0 = sld [smem:[#allocation15_spill]]  ;;  %s220_s11 = scalar_lea.vmem [#allocation2], %s725_s6 }
  0x1c   : > { %s232_s12 = sshll.u32 %s220_s11, 4  ;;  %p1190_p0 = pnand %p808_p13, %p1149_p4  ;;  %s1186_s12 = int_to_ptr.vmem [resolvable:$true] %s232_s12 }
  0x1d   : > { %s217_s14 = scalar_lea.sflag [#allocation3], %s1177_s5 }
  0x1e   : > { %p865_p3 = pneg %p1190_p0 }
  0x21   : > { %s1184_s10 = scalar_lea.hbm %s1520_s0, %s775_s7  ;;  %s868_s25 = scalar_lea.hbm %s1520_s0, 4096 }
  0x22   : > { %s863_s24 = scalar_lea.hbm %s1184_s10, 2048  ;;  %p869_p4 = scmp.lt.u32.totalorder %s1184_s10, %s1520_s0 }
  0x23   : > { %p864_p2 = scmp.ne.s32.totalorder %s1184_s10, %s863_s24  ;;  %p870_p7 = scmp.lt.u32.totalorder %s868_s25, %s863_s24 }
  0x24   : > { %p872_p13 = scmp.lt.u32.totalorder %s863_s24, %s1184_s10 }
  0x25   : > { %p866_p5 = pnand %p865_p3, %p864_p2  ;;  %p871_p10 = por %p870_p7, %p869_p4 }
  0x27   : > { %p867_p6 = pneg %p866_p5  ;;  %p873_p12 = por %p872_p13, %p871_p10 }
  0x29   : > { %p874_p1 = pnand %p873_p12, %p867_p6 }
  0x2b   : > { %877 = shalt.err (!%p874_p1)
}
  0x2c   : > { %s878_s9 = scalar_lea.vmem %s1186_s12, 2048  ;;  %s1071_s11 = smov [#allocation2]  }
  0x2d   : > { %p879_p2 = scmp.ne.s32.totalorder %s1186_s12, %s878_s9  ;;  %s883_s26 = sshll.u32 %s1071_s11, 4  ;;  %s884_s26 = int_to_ptr.vmem [resolvable:$false] %s883_s26 }
  0x2e   : > { %s885_s6 = scalar_lea.vmem %s884_s26, 4096  ;;  %p886_p9 = scmp.lt.s32.totalorder %s1186_s12, %s884_s26 }
  0x2f   : > { %p881_p5 = pnand %p879_p2, %p865_p3  ;;  %p887_p4 = scmp.lt.s32.totalorder %s885_s6, %s878_s9 }
  0x31   : > { %p882_p11 = pneg %p881_p5  ;;  %p888_p7 = por %p887_p4, %p886_p9 }
  0x33   : > { %p889_p10 = pnand %p888_p7, %p882_p11 }
  0x35   : > { %892 = shalt.err (!%p889_p10)
}
  0x36   : > { %s1513_s24 = smov 128   ;;  %s1073_s25 = smov 8  }
  0x37   : > { %794 = dma.hbm_to_vmem [thread:$0]  (!%p1190_p0), %s1184_s10, 2048, %s1186_s12, %s217_s14, %s1513_s24, %s1513_s24, %s1073_s25  }
  0x38   : > { %p266_p9 = scmp.lt.s32.totalorder %s1069_s20, 3  ;;  %s728_s7 = sshll.u32 %s1177_s5, 5 }
  0x39   : > { %s776_s8 = sshll.u32 %s1065_s19, 9  ;;  %p1522_p11 = scmp.ge.s32.totalorder %s1069_s20, 1 }
  0x3a   : > { %s1238_s6 = scalar_lea.hbm %s1507_s1, %s776_s8  ;;  %s246_s22 = scalar_lea.vmem [#allocation5], %s728_s7 }
  0x3b   : > { %p1231_p12 = pnand %p1522_p11, %p266_p9  ;;  %s258_s0 = sshll.u32 %s246_s22, 4  ;;  %s1240_s0 = int_to_ptr.vmem [resolvable:$true] %s258_s0 }
  0x3c   : > { %s243_s10 = scalar_lea.sflag [#allocation6], %s1177_s5  ;;  %s893_s12 = scalar_lea.hbm %s1238_s6, 512 }
  0x3d   : > { %p894_p1 = scmp.ne.s32.totalorder %s1238_s6, %s893_s12  ;;  %s898_s8 = scalar_lea.hbm %s1507_s1, 1024 }
  0x3e   : > { %p899_p2 = scmp.lt.u32.totalorder %s1238_s6, %s1507_s1  ;;  %p900_p5 = scmp.lt.u32.totalorder %s898_s8, %s893_s12 }
  0x3f   : > { %p896_p6 = pnand %p894_p1, %p865_p3  ;;  %p902_p7 = scmp.lt.u32.totalorder %s893_s12, %s1238_s6 }
  0x40   : > { %p901_p4 = por %p900_p5, %p899_p2 }
  0x41   : > { %p897_p13 = pneg %p896_p6 }
  0x42   : > { %p903_p10 = por %p902_p7, %p901_p4 }
  0x44   : > { %p904_p9 = pnand %p903_p10, %p897_p13 }
  0x46   : > { %907 = shalt.err (!%p904_p9)
}
  0x47   : > { %s908_s22 = scalar_lea.vmem %s1240_s0, 512  ;;  %s1074_s24 = smov [#allocation5]  }
  0x48   : > { %p909_p11 = scmp.ne.s32.totalorder %s1240_s0, %s908_s22  ;;  %s913_s7 = sshll.u32 %s1074_s24, 4  ;;  %s914_s7 = int_to_ptr.vmem [resolvable:$false] %s913_s7 }
  0x49   : > { %s915_s14 = scalar_lea.vmem %s914_s7, 1024  ;;  %p916_p8 = scmp.lt.s32.totalorder %s1240_s0, %s914_s7 }
  0x4a   : > { %p911_p1 = pnand %p909_p11, %p865_p3  ;;  %p917_p2 = scmp.lt.s32.totalorder %s915_s14, %s908_s22 }
  0x4c   : > { %p912_p6 = pneg %p911_p1  ;;  %p918_p5 = por %p917_p2, %p916_p8 }
  0x4e   : > { %p919_p4 = pnand %p918_p5, %p912_p6 }
  0x50   : > { %922 = shalt.err (!%p919_p4)
}
  0x51   : > { %s1524_s12 = smov 128   ;;  %270 = sbr.rel (%p1231_p12) target bundleno = 168 (0xa8), region = 28 }
  0x52   : > { %797 = dma.hbm_to_vmem [thread:$0]  (!%p1190_p0), %s1238_s6, 512, %s1240_s0, %s243_s10, %s1524_s12, %s1524_s12, %s1073_s25  }
  0x53   : > { %s1274_s8 = sand.u32 (!%p1231_p12), 1, %s1053_s16   ;;  %p1525_p8 = scmp.ne.s32.totalorder (!%p1231_p12), %s1517_s27, 0 }
  0x54   : > { %s732_s11 = sshll.u32 (!%p1231_p12), %s1274_s8, 7  ;;  %s273_s26 = scalar_lea.sflag (!%p1231_p12), [#allocation3], %s1274_s8 }
  0x55   : > { %s276_s13 = scalar_lea.vmem (!%p1231_p12), [#allocation2], %s732_s11 }
  0x58   : > { %1032 = dma.done.wait (%p1525_p8), %s273_s26, 2048  }
  0x59   : > { %1034 = vsyncadd (%p1525_p8), %s273_s26, 4294965248  ;;  %s733_s0 = sshll.u32 %s1274_s8, 5  ;;  %s282_s5 = scalar_lea.sflag [#allocation6], %s1274_s8 }
  0x5a   : > { %s285_s25 = scalar_lea.vmem [#allocation5], %s733_s0 }
  0x5b   : > { %1036 = dma.done.wait (%p1525_p8), %s282_s5, 512  }
  0x5c   : > { %1038 = vsyncadd (%p1525_p8), %s282_s5, 4294966784  ;;  %s1289_s9 = smul.u32 24, %s1274_s8  ;;  %v734_v0 = vld [vmem:[%s276_s13 + $0x20] sm:$0xff]  ;;  %v735_v1 = vld [vmem:[%s276_s13 + $0x28] sm:$0xff]  ;;  %s490_s27 = sand.u32 1, %s1137_s21   ;;  %v1075_v30 = vmov 0.0  }
  0x5d   : > { %v736_v2 = vld [vmem:[%s276_s13 + $0x30] sm:$0xff]  ;;  %v370_v3 = vadd.f32 %v735_v1, %v734_v0  ;;  %v742_v4 = vld [vmem:[%s276_s13 + $0x40] sm:$0xff]  ;;  %v743_v5 = vld [vmem:[%s276_s13 + $0x48] sm:$0xff]  ;;  %s1318_s6 = smul.u32 384, %s1061_s18  ;;  %s1359_s14 = scalar_lea.sflag [#allocation9], %s490_s27 }
  0x5e   : > { %v737_v6 = vld [vmem:[%s276_s13 + $0x38] sm:$0xff]  ;;  %v744_v7 = vld [vmem:[%s276_s13 + $0x50] sm:$0xff]  ;;  %v403_v8 = vadd.f32 %v743_v5, %v742_v4  ;;  %v1291_v9 = vld [vmem:[%s276_s13 + $0x60] sm:$0xff]  ;;  %s317_s10 = scalar_lea.vmem [#allocation8], %s1289_s9  ;;  %p1526_p3 = scmp.ne.s32.totalorder %s1518_s28, 0 }
  0x5f   : > { %v371_v10 = vadd.f32 %v736_v2, %v370_v3  ;;  %v745_v11 = vld [vmem:[%s276_s13 + $0x58] sm:$0xff]  ;;  %v1293_v12 = vld [vmem:[%s276_s13 + $0x68] sm:$0xff]  ;;  %v1295_v13 = vld [vmem:[%s276_s13 + $0x70] sm:$0xff]  ;;  %s527_s22 = sshll.u32 %s317_s10, 4  ;;  %s1342_s7 = scalar_lea.hbm %s1509_s3, %s1318_s6  ;;  %s1344_s22 = int_to_ptr.vmem [resolvable:$true] %s527_s22 }
  0x60   : > { %v404_v14 = vadd.f32 %v744_v7, %v403_v8  ;;  %v436_v15 = vadd.f32 %v1293_v12, %v1291_v9  ;;  %v1299_v16 = vld [vmem:[%s285_s25] sm:$0xff]  ;;  %v1301_v17 = vld [vmem:[%s285_s25 + $0x8] sm:$0xff]  ;;  %v1303_v18 = vld [vmem:[%s285_s25 + $0x10] sm:$0xff]  ;;  %s923_s12 = scalar_lea.vmem %s1344_s22, 384  ;;  %s1076_s11 = smov [#allocation8]  }
  0x61   : > { %v372_v19 = vadd.f32 %v737_v6, %v371_v10  ;;  %v1305_v20 = vld [vmem:[%s276_s13 + $0x78] sm:$0xff]  ;;  %vm358_vm0 = vcmp.eq.s32.totalorder %v1299_v16, 1  ;;  %vm359_vm1 = vcmp.eq.s32.totalorder %v1301_v17, 1  ;;  %vm360_vm2 = vcmp.eq.s32.totalorder %v1303_v18, 1  ;;  %p924_p0 = scmp.ne.s32.totalorder %s1344_s22, %s923_s12  ;;  %s927_s26 = sshll.u32 %s1076_s11, 4  ;;  %s928_s26 = int_to_ptr.vmem [resolvable:$false] %s927_s26 }
  0x62   : > { %v1307_v21 = vld [vmem:[%s285_s25 + $0x18] sm:$0xff]  ;;  %v405_v22 = vadd.f32 %v745_v11, %v404_v14  ;;  %v437_v23 = vadd.f32 %v1295_v13, %v436_v15  ;;  %v362_v24 = vsel %vm358_vm0, %v734_v0, 0.0  ;;  %v363_v25 = vsel %vm359_vm1, %v735_v1, 0.0  ;;  %s929_s13 = scalar_lea.vmem %s928_s26, 768  ;;  %p930_p7 = scmp.lt.s32.totalorder %s1344_s22, %s928_s26 }
  0x63   : > { %vm361_vm3 = vcmp.eq.s32.totalorder %v1307_v21, 1  ;;  %v364_v26 = vsel %vm360_vm2, %v736_v2, 0.0  ;;  %v366_v29 = vadd.f32 %v363_v25, %v362_v24  ;;  %v738_v31 = vsel %vm358_vm0, 1.0, %v1075_v30  ;;  %457 = vst [vmem:[%s317_s10] sm:$0xff] %v372_v19  ;;  %p925_p12 = pnand %p924_p0, %p1526_p3  ;;  %p931_p10 = scmp.lt.s32.totalorder %s929_s13, %s923_s12 }
  0x64   : > { %v365_v27 = vsel %vm361_vm3, %v737_v6, 0.0  ;;  %v438_v28 = vadd.f32 %v1305_v20, %v437_v23  ;;  %v739_v32 = vsel %vm359_vm1, 1.0, %v1075_v30  ;;  %v740_v33 = vsel %vm360_vm2, 1.0, %v1075_v30  ;;  %761 = vst [vmem:[%s317_s10 + $0x8] sm:$0xff] %v405_v22 }
  0x65   : > { %v741_v34 = vsel %vm361_vm3, 1.0, %v1075_v30  ;;  %vm391_vm4 = vcmp.eq.s32.totalorder %v1299_v16, 2  ;;  %v367_v35 = vadd.f32 %v366_v29, %v364_v26  ;;  %v382_v36 = vadd.f32 %v739_v32, %v738_v31  ;;  %p926_p13 = pneg %p925_p12  ;;  %p932_p9 = por %p931_p10, %p930_p7 }
  0x66   : > { %vm392_vm5 = vcmp.eq.s32.totalorder %v1301_v17, 2  ;;  %vm393_vm6 = vcmp.eq.s32.totalorder %v1303_v18, 2  ;;  %vm394_vm7 = vcmp.eq.s32.totalorder %v1307_v21, 2  ;;  %v395_v37 = vsel %vm391_vm4, %v742_v4, 0.0  ;;  %767 = vst [vmem:[%s317_s10 + $0x10] sm:$0xff] %v438_v28 }
  0x67   : > { %v396_v38 = vsel %vm392_vm5, %v743_v5, 0.0  ;;  %v368_v39 = vadd.f32 %v367_v35, %v365_v27  ;;  %v383_v40 = vadd.f32 %v740_v33, %v382_v36  ;;  %v397_v41 = vsel %vm393_vm6, %v744_v7, 0.0  ;;  %p933_p11 = pnand %p932_p9, %p926_p13 }
  0x68   : > { %v398_v42 = vsel %vm394_vm7, %v745_v11, 0.0  ;;  %v399_v43 = vadd.f32 %v396_v38, %v395_v37  ;;  %v746_v44 = vsel %vm391_vm4, 1.0, %v1075_v30  ;;  %v747_v45 = vsel %vm392_vm5, 1.0, %v1075_v30 }
  0x69   : > { %v748_v46 = vsel %vm393_vm6, 1.0, %v1075_v30 }
  0x6a   : > { %936 = shalt.err (!%p933_p11)
}
  0x6b   : > { %s937_s21 = scalar_lea.hbm %s1342_s7, 384  ;;  %s941_s25 = scalar_lea.hbm %s1509_s3, 768 }
  0x6c   : > { %p938_p1 = scmp.ne.s32.totalorder %s1342_s7, %s937_s21  ;;  %p942_p5 = scmp.lt.u32.totalorder %s1342_s7, %s1509_s3 }
  0x6d   : > { %p943_p4 = scmp.lt.u32.totalorder %s941_s25, %s937_s21  ;;  %p945_p0 = scmp.lt.u32.totalorder %s937_s21, %s1342_s7 }
  0x6e   : > { %p939_p6 = pnand %p938_p1, %p1526_p3 }
  0x6f   : > { %p944_p8 = por %p943_p4, %p942_p5 }
  0x70   : > { %p940_p2 = pneg %p939_p6 }
  0x71   : > { %p946_p12 = por %p945_p0, %p944_p8 }
  0x73   : > { %p947_p13 = pnand %p946_p12, %p940_p2 }
  0x75   : > { %950 = shalt.err (!%p947_p13)
}
  0x76   : > { %s1077_s18 = smov 128   ;;  %s1078_s24 = smov 8   ;;  %v384_v47 = vadd.f32 %v741_v34, %v383_v40  ;;  %v749_v48 = vsel %vm394_vm7, 1.0, %v1075_v30  ;;  %v415_v49 = vadd.f32 %v747_v45, %v746_v44  ;;  %v400_v50 = vadd.f32 %v399_v43, %v397_v41 }
  0x77   : > { %786 = dma.vmem_to_hbm [thread:$0]  (%p1526_p3), %s1344_s22, 384, %s1342_s7, %s1359_s14, %s1077_s18, %s1077_s18, %s1078_s24   ;;  %vm424_vm8 = vcmp.eq.s32.totalorder %v1299_v16, 3  ;;  %vm425_vm9 = vcmp.eq.s32.totalorder %v1301_v17, 3  ;;  %vm426_vm10 = vcmp.eq.s32.totalorder %v1303_v18, 3  ;;  %vm427_vm11 = vcmp.eq.s32.totalorder %v1307_v21, 3 }
  0x78   : > { %s1393_s12 = scalar_lea.vmem [#allocation7], %s1289_s9  ;;  %v416_v51 = vadd.f32 %v748_v46, %v415_v49  ;;  %v428_v52 = vsel %vm424_vm8, %v1291_v9, 0.0  ;;  %v401_v53 = vadd.f32 %v400_v50, %v398_v42  ;;  %v429_v54 = vsel %vm425_vm9, %v1293_v12, 0.0  ;;  %s324_s22 = scalar_lea.vmem [#allocation10], %s1289_s9 }
  0x79   : > { %454 = vst [vmem:[%s1393_s12] sm:$0xff] %v368_v39  ;;  %v430_v55 = vsel %vm426_vm10, %v1295_v13, 0.0  ;;  %460 = vst [vmem:[%s324_s22] sm:$0xff] %v384_v47  ;;  %v432_v57 = vadd.f32 %v429_v54, %v428_v52  ;;  %v754_v58 = vsel %vm424_vm8, 1.0, %v1075_v30  ;;  %v755_v59 = vsel %vm425_vm9, 1.0, %v1075_v30  ;;  %s510_s9 = sshll.u32 %s1393_s12, 4  ;;  %s544_s7 = sshll.u32 %s324_s22, 4  ;;  %s1418_s9 = int_to_ptr.vmem [resolvable:$true] %s510_s9  ;;  %s1426_s7 = int_to_ptr.vmem [resolvable:$true] %s544_s7 }
  0x7a   : > { %v417_v56 = vadd.f32 %v749_v48, %v416_v51  ;;  %v431_v60 = vsel %vm427_vm11, %v1305_v20, 0.0  ;;  %v756_v61 = vsel %vm426_vm10, 1.0, %v1075_v30  ;;  %v448_v62 = vadd.f32 %v755_v59, %v754_v58  ;;  %759 = vst [vmem:[%s1393_s12 + $0x8] sm:$0xff] %v401_v53  ;;  %s1416_s13 = scalar_lea.hbm %s1508_s2, %s1318_s6  ;;  %s1424_s5 = scalar_lea.hbm %s1510_s4, %s1318_s6 }
  0x7b   : > { %v433_v63 = vadd.f32 %v432_v57, %v430_v55  ;;  %v757_v0 = vsel %vm427_vm11, 1.0, %v1075_v30  ;;  %s486_s25 = scalar_lea.sflag [#allocation4], %s1274_s8  ;;  %s951_s27 = scalar_lea.vmem %s1418_s9, 384 }
  0x7c   : > { %v449_v1 = vadd.f32 %v756_v61, %v448_v62  ;;  %763 = vst [vmem:[%s324_s22 + $0x8] sm:$0xff] %v417_v56  ;;  %p952_p7 = scmp.ne.s32.totalorder %s1418_s9, %s951_s27  ;;  %s1079_s10 = smov [#allocation7]  }
  0x7d   : > { %v434_v2 = vadd.f32 %v433_v63, %v431_v60  ;;  %s955_s11 = sshll.u32 %s1079_s10, 4  ;;  %s956_s11 = int_to_ptr.vmem [resolvable:$false] %s955_s11 }
  0x7e   : > { %v450_v3 = vadd.f32 %v757_v0, %v449_v1  ;;  %p953_p10 = pnand %p952_p7, %p1526_p3  ;;  %s957_s26 = scalar_lea.vmem %s956_s11, 768 }
  0x7f   : > { %765 = vst [vmem:[%s1393_s12 + $0x10] sm:$0xff] %v434_v2  ;;  %p958_p11 = scmp.lt.s32.totalorder %s1418_s9, %s956_s11  ;;  %p959_p1 = scmp.lt.s32.totalorder %s957_s26, %s951_s27 }
  0x80   : > { %769 = vst [vmem:[%s324_s22 + $0x10] sm:$0xff] %v450_v3  ;;  %p954_p9 = pneg %p953_p10 }
  0x81   : > { %p960_p6 = por %p959_p1, %p958_p11 }
  0x83   : > { %p961_p2 = pnand %p960_p6, %p954_p9 }
  0x85   : > { %964 = shalt.err (!%p961_p2)
}
  0x86   : > { %s965_s6 = scalar_lea.hbm %s1416_s13, 384  ;;  %s969_s21 = scalar_lea.hbm %s1508_s2, 768 }
  0x87   : > { %p966_p5 = scmp.ne.s32.totalorder %s1416_s13, %s965_s6  ;;  %p970_p0 = scmp.lt.u32.totalorder %s1416_s13, %s1508_s2 }
  0x88   : > { %p971_p12 = scmp.lt.u32.totalorder %s969_s21, %s965_s6  ;;  %p973_p7 = scmp.lt.u32.totalorder %s965_s6, %s1416_s13 }
  0x89   : > { %p967_p4 = pnand %p966_p5, %p1526_p3 }
  0x8a   : > { %p972_p13 = por %p971_p12, %p970_p0 }
  0x8b   : > { %p968_p8 = pneg %p967_p4 }
  0x8c   : > { %p974_p10 = por %p973_p7, %p972_p13 }
  0x8e   : > { %p975_p9 = pnand %p974_p10, %p968_p8 }
  0x90   : > { %978 = shalt.err (!%p975_p9)
}
  0x91   : > { %785 = dma.vmem_to_hbm [thread:$0]  (%p1526_p3), %s1418_s9, 384, %s1416_s13, %s486_s25, %s1077_s18, %s1077_s18, %s1078_s24  }
  0x92   : > { %s979_s27 = scalar_lea.vmem %s1426_s7, 384  ;;  %s1080_s11 = smov [#allocation10]  }
  0x93   : > { %p980_p11 = scmp.ne.s32.totalorder %s1426_s7, %s979_s27  ;;  %s983_s26 = sshll.u32 %s1080_s11, 4  ;;  %s984_s26 = int_to_ptr.vmem [resolvable:$false] %s983_s26 }
  0x94   : > { %s985_s6 = scalar_lea.vmem %s984_s26, 768  ;;  %p986_p2 = scmp.lt.s32.totalorder %s1426_s7, %s984_s26 }
  0x95   : > { %p981_p1 = pnand %p980_p11, %p1526_p3  ;;  %p987_p5 = scmp.lt.s32.totalorder %s985_s6, %s979_s27 }
  0x97   : > { %p982_p6 = pneg %p981_p1  ;;  %p988_p4 = por %p987_p5, %p986_p2 }
  0x99   : > { %p989_p8 = pnand %p988_p4, %p982_p6 }
  0x9b   : > { %992 = shalt.err (!%p989_p8)
}
  0x9c   : > { %s993_s8 = scalar_lea.hbm %s1424_s5, 384  ;;  %s997_s25 = scalar_lea.hbm %s1510_s4, 768 }
  0x9d   : > { %p994_p0 = scmp.ne.s32.totalorder %s1424_s5, %s993_s8  ;;  %p998_p7 = scmp.lt.u32.totalorder %s1424_s5, %s1510_s4 }
  0x9e   : > { %p999_p10 = scmp.lt.u32.totalorder %s997_s25, %s993_s8  ;;  %p1001_p11 = scmp.lt.u32.totalorder %s993_s8, %s1424_s5 }
  0x9f   : > { %p995_p12 = pnand %p994_p0, %p1526_p3 }
  0xa0   : > { %p1000_p9 = por %p999_p10, %p998_p7 }
  0xa1   : > { %p996_p13 = pneg %p995_p12 }
  0xa2   : > { %p1002_p1 = por %p1001_p11, %p1000_p9 }
  0xa4   : > { %p1003_p6 = pnand %p1002_p1, %p996_p13 }
  0xa6   : > { %1006 = shalt.err (!%p1003_p6)
}
  0xa7   : > { %787 = dma.vmem_to_hbm [thread:$0]  (%p1526_p3), %s1426_s7, 384, %s1424_s5, %s1359_s14, %s1077_s18, %s1077_s18, %s1078_s24  }
  0xa8 PF: > { %s559_s21 = sand.u32 1, %s1049_s15   ;;  %p1527_p2 = scmp.ne.s32.totalorder %s1519_s30, 0 }
  0xa9   : > { %p1528_p5 = scmp.ge.s32.totalorder %s1069_s20, 2  ;;  %s560_s0 = scalar_lea.sflag [#allocation4], %s559_s21 }
  0xab   : > { %p799_p4 = pnand %p1528_p5, %p1527_p2 }
  0xad   : > { %1040 = dma.done.wait (!%p799_p4), %s560_s0, 384  }
  0xae   : > { %1042 = vsyncadd (!%p799_p4), %s560_s0, 4294966912  ;;  %s1529_s28 = sadd.s32 4294967294, %s1069_s20  }
  0xaf   : > { %s568_s10 = sand.u32 1, %s1529_s28  }
  0xb0   : > { %s569_s27 = scalar_lea.sflag [#allocation9], %s568_s10 }
  0xb1   : > { %1044 = dma.done.wait (!%p799_p4), %s569_s27, 768  }
  0xb2   : > { %1046 = vsyncadd (!%p799_p4), %s569_s27, 4294966528  ;;  %s27_s20 = sadd.s32 1, %s1069_s20   ;;  %s1530_s15 = smov %s1053_s16 }
  0xb3   : > { %p24_p3 = scmp.ge.s32.totalorder %s27_s20, 4   ;;  %s1531_s16 = smov %s1057_s17 }
  0xb4   : > { %s1532_s17 = smov %s1168_s29  ;;  %s1533_s18 = smov %s1065_s19 }
  0xb5   : > { %s1534_s19 = smov %s1536_s23  ;;  %26 = sbr.rel (!%p24_p3) target bundleno = 12 (0xc), region = 131 }
  0xbc   :  { %583 = vsyncpa [#allocation3], 1 }
  0xbd   :  { %585 = vsyncpa [#allocation3 + $0x1], 1 }
  0xbe   :  { %586 = vsyncpa [#allocation6], 1 }
  0xbf   :  { %588 = vsyncpa [#allocation6 + $0x1], 1 }
  0xc0   :  { %589 = vsyncpa [#allocation4], 1 }
  0xc1   :  { %591 = vsyncpa [#allocation4 + $0x1], 1 }
  0xc2   :  { %592 = vsyncpa [#allocation9], 1 }
  0xc3   :  { %594 = vsyncpa [#allocation9 + $0x1], 1 }

</bundles_post_ra>
